<compile_context>
chip_gen: v7x
topology: tpu7x:2x2x1
jax: 0.10.0
libtpu: 0.0.40
codegen_flags: <defaults>
</compile_context>

<pallas_src>
import jax
import jax.numpy as jnp
from jax.experimental import pallas as pl
from jax.experimental.pallas import tpu as pltpu

LN_EPS = 1e-5
_LANE = 128
_SUBLANE = 8


def _round_up(v, m):
    return (v + m - 1) // m * m


def _default_vmem_budget():
    """Generation-aware usable-VMEM budget (leave ~25% headroom for compiler scratch)."""
    try:
        cap = pltpu.get_tpu_info().vmem_capacity_bytes
    except Exception:
        cap = 64 * 1024 * 1024  # conservative fallback: v7x per-core VMEM
    return int(cap) * 3 // 4    # ~48 MiB on v7x, ~96 MiB on v5e/v6e


# ---------------------------------------------------------------------------
# Kernels
# ---------------------------------------------------------------------------

def _fused_kernel(x_ref, w1_ref, b1_ref, g_ref, beta_ref, w2_ref, b2_ref, o_ref):
    """Whole forward for one row tile; W1 fully resident (no K tiling)."""
    # bf16 cast in-kernel (VPU, hidden under the DMA pipeline); f32 accumulation.
    h = jnp.dot(x_ref[...].astype(jnp.bfloat16), w1_ref[...],
                preferred_element_type=jnp.float32)
    h = h + b1_ref[...]

    # LayerNorm over the hidden (lane) dim; stats in f32 (v5e-safe).
    # One-pass mean / mean-of-squares (one fewer XLU reduce); clamped >= 0.
    mean = jnp.mean(h, axis=-1, keepdims=True)
    mean_sq = jnp.mean(h * h, axis=-1, keepdims=True)
    var = jnp.maximum(mean_sq - mean * mean, 0.0)
    h = (h - mean) * jax.lax.rsqrt(var + LN_EPS)      # rsqrt -> EUP slot
    h = h * g_ref[...] + beta_ref[...]
    h = jnp.maximum(h, 0.0)                           # ReLU (VPU)

    out = jnp.dot(h.astype(jnp.bfloat16), w2_ref[...],
                  preferred_element_type=jnp.float32)
    o_ref[...] = (out + b2_ref[...]).astype(o_ref.dtype)


def _ktiled_kernel(x_ref, w1_ref, b1_ref, g_ref, beta_ref, w2_ref, b2_ref,
                   o_ref, acc_ref):
    """lin1 K-tiled over input_size (grid axis 1, 'arbitrary'); f32 acc scratch."""
    k = pl.program_id(1)

    @pl.when(k == 0)
    def _():
        acc_ref[...] = jnp.zeros_like(acc_ref)

    acc_ref[...] += jnp.dot(x_ref[...].astype(jnp.bfloat16), w1_ref[...],
                            preferred_element_type=jnp.float32)

    @pl.when(k == pl.num_programs(1) - 1)
    def _():
        h = acc_ref[...] + b1_ref[...]
        mean = jnp.mean(h, axis=-1, keepdims=True)
        mean_sq = jnp.mean(h * h, axis=-1, keepdims=True)
        var = jnp.maximum(mean_sq - mean * mean, 0.0)
        h = (h - mean) * jax.lax.rsqrt(var + LN_EPS)
        h = h * g_ref[...] + beta_ref[...]
        h = jnp.maximum(h, 0.0)
        out = jnp.dot(h.astype(jnp.bfloat16), w2_ref[...],
                      preferred_element_type=jnp.float32)
        o_ref[...] = (out + b2_ref[...]).astype(o_ref.dtype)


# ---------------------------------------------------------------------------
# One-time parameter preparation (hoisted out of the per-call wrapper)
# ---------------------------------------------------------------------------

def prepare_simple_dense_params(w1, b1, gamma, beta, w2, b2, *, vmem_budget_bytes=None):
    """Pre-cast / pre-pad the weights once.  w1: [in, hidden], w2: [hidden, out]."""
    input_size, hidden_size = w1.shape
    output_size = w2.shape[1]
    out_pad = _round_up(output_size, _LANE)          # lane-dense output (unmasked vst)
    if vmem_budget_bytes is None:
        vmem_budget_bytes = _default_vmem_budget()

    # Decide whether W1 can stay fully resident (single-buffered, bf16) next to
    # W2/params and the streaming x / out tiles at the floor row tile (256).
    other_resident = hidden_size * out_pad * 2 + (3 * hidden_size + out_pad) * 4
    stream_reserve = 256 * (2 * input_size * 4 + 2 * out_pad * 4 + 3 * hidden_size * 4)
    w1_budget = vmem_budget_bytes - other_resident - stream_reserve
    w1_bytes = input_size * hidden_size * 2

    if w1_bytes <= max(w1_budget, 0):
        tile_k = input_size
    else:
        # Stream 128-aligned row-chunks of W1 (double-buffered along K).
        rows = ((max(w1_budget, 2 * _LANE * hidden_size * 2) // 2)
                // (hidden_size * 2)) // _LANE * _LANE
        rows = max(int(rows), _LANE)
        tile_k = min(rows, input_size)
        if tile_k >= input_size:
            tile_k = input_size
    k_pad = input_size if tile_k == input_size else _round_up(input_size, tile_k)

    w1_bf = w1.astype(jnp.bfloat16)
    if k_pad != input_size:
        w1_bf = jnp.pad(w1_bf, ((0, k_pad - input_size), (0, 0)))     # zeros: exact
    w2_bf = jnp.pad(w2, ((0, 0), (0, out_pad - output_size))).astype(jnp.bfloat16)
    b2_2d = jnp.pad(b2, (0, out_pad - output_size)).reshape(1, out_pad).astype(jnp.float32)

    return dict(
        input_size=input_size, hidden_size=hidden_size, output_size=output_size,
        out_pad=out_pad, tile_k=tile_k, k_pad=k_pad,
        vmem_budget_bytes=vmem_budget_bytes,
        w1_bf=w1_bf, w2_bf=w2_bf,
        b1_2d=b1.reshape(1, hidden_size).astype(jnp.float32),
        g_2d=gamma.reshape(1, hidden_size).astype(jnp.float32),
        be_2d=beta.reshape(1, hidden_size).astype(jnp.float32),
        b2_2d=b2_2d,
    )


def _fit_tile_n(tile_n_req, n, fixed_bytes, per_row_bytes, budget_bytes):
    tile_n = _round_up(max(tile_n_req, _SUBLANE), _SUBLANE)
    tile_n = min(tile_n, _round_up(n, _SUBLANE))
    # Guarantee >= 2 row tiles when the data allows it so the "parallel" axis
    # has work for both v7x TensorCores (no-op / harmless on 1-TC chips).
    tile_n = min(tile_n, max(_SUBLANE, _round_up(pl.cdiv(n, 2), _SUBLANE)))
    # Shrink only the tile_n-dependent terms; never below 256 rows — the
    # weight-resident term is bounded by K-tiling instead.
    floor = min(256, _round_up(n, _SUBLANE))
    while tile_n > floor and fixed_bytes + tile_n * per_row_bytes > budget_bytes:
        tile_n = max(floor, _round_up(tile_n // 2, _SUBLANE))
    return tile_n


# ---------------------------------------------------------------------------
# Per-call wrapper
# ---------------------------------------------------------------------------

def simple_dense_pallas(x, params, *, tile_n=512):
    """x: [..., input_size]; params from prepare_simple_dense_params. Returns [..., output_size]."""
    p = params
    input_size, hidden_size = p["input_size"], p["hidden_size"]
    output_size, out_pad = p["output_size"], p["out_pad"]
    tile_k, k_pad = p["tile_k"], p["k_pad"]
    budget = p["vmem_budget_bytes"]
    out_dtype = x.dtype

    lead_shape = x.shape[:-1]
    n = 1
    for d in lead_shape:
        n *= d
    x2d = x.reshape(n, input_size)        # native dtype: no bf16/pad copy of x
    x_item = x2d.dtype.itemsize

    const = dict(pipeline_mode=pl.Buffered(1))   # constant index_map -> single buffer
    weight_bytes = (p["w1_bf"].size + p["w2_bf"].size) * 2 \
        + (p["b1_2d"].size + p["g_2d"].size + p["be_2d"].size + p["b2_2d"].size) * 4
    cost = pl.CostEstimate(
        flops=2 * n * (input_size * hidden_size + hidden_size * out_pad),
        transcendentals=n,
        bytes_accessed=n * input_size * x_item + weight_bytes
        + n * out_pad * jnp.dtype(out_dtype).itemsize,
    )

    if tile_k == input_size:
        # ---------- fused single-pass kernel (W1 fully resident) ----------
        fixed = (input_size * hidden_size + hidden_size * out_pad) * 2 \
            + (3 * hidden_size + out_pad) * 4
        per_row = 2 * input_size * x_item + 2 * out_pad * 4 + 2 * hidden_size * 4
        tn = _fit_tile_n(tile_n, n, fixed, per_row, budget)
        grid = (pl.cdiv(n, tn),)          # ragged last tile handled by Pallas masking

        out2d = pl.pallas_call(
            _fused_kernel,
            out_shape=jax.ShapeDtypeStruct((n, out_pad), out_dtype),
            grid_spec=pltpu.PrefetchScalarGridSpec(
                num_scalar_prefetch=0,
                grid=grid,
                in_specs=[
                    pl.BlockSpec((tn, input_size), lambda i: (i, 0)),
                    pl.BlockSpec((input_size, hidden_size), lambda i: (0, 0), **const),
                    pl.BlockSpec((1, hidden_size), lambda i: (0, 0), **const),
                    pl.BlockSpec((1, hidden_size), lambda i: (0, 0), **const),
                    pl.BlockSpec((1, hidden_size), lambda i: (0, 0), **const),
                    pl.BlockSpec((hidden_size, out_pad), lambda i: (0, 0), **const),
                    pl.BlockSpec((1, out_pad), lambda i: (0, 0), **const),
                ],
                out_specs=pl.BlockSpec((tn, out_pad), lambda i: (i, 0)),
            ),
            compiler_params=pltpu.CompilerParams(
                dimension_semantics=("parallel",),
                vmem_limit_bytes=budget,
            ),
            cost_estimate=cost,
        )(x2d, p["w1_bf"], p["b1_2d"], p["g_2d"], p["be_2d"], p["w2_bf"], p["b2_2d"])
    else:
        # ---------- K-tiled lin1 (W1 streamed along input_size) ----------
        if k_pad != input_size:
            # Rare huge-weight regime: the f32 column-pad copy of x is negligible
            # next to the matmul in this regime (zeros contribute nothing -> exact).
            x2d = jnp.pad(x2d, ((0, 0), (0, k_pad - input_size)))
        fixed = 2 * tile_k * hidden_size * 2 + hidden_size * out_pad * 2 \
            + (3 * hidden_size + out_pad) * 4
        per_row = 2 * tile_k * x_item + 2 * out_pad * 4 + 3 * hidden_size * 4
        tn = _fit_tile_n(tile_n, n, fixed, per_row, budget)
        grid = (pl.cdiv(n, tn), k_pad // tile_k)

        out2d = pl.pallas_call(
            _ktiled_kernel,
            out_shape=jax.ShapeDtypeStruct((n, out_pad), out_dtype),
            grid_spec=pltpu.PrefetchScalarGridSpec(
                num_scalar_prefetch=0,
                grid=grid,
                in_specs=[
                    pl.BlockSpec((tn, tile_k), lambda i, k: (i, k)),
                    pl.BlockSpec((tile_k, hidden_size), lambda i, k: (k, 0)),
                    pl.BlockSpec((1, hidden_size), lambda i, k: (0, 0), **const),
                    pl.BlockSpec((1, hidden_size), lambda i, k: (0, 0), **const),
                    pl.BlockSpec((1, hidden_size), lambda i, k: (0, 0), **const),
                    pl.BlockSpec((hidden_size, out_pad), lambda i, k: (0, 0), **const),
                    pl.BlockSpec((1, out_pad), lambda i, k: (0, 0), **const),
                ],
                out_specs=pl.BlockSpec((tn, out_pad), lambda i, k: (i, 0)),
                scratch_shapes=[pltpu.VMEM((tn, hidden_size), jnp.float32)],
            ),
            compiler_params=pltpu.CompilerParams(
                dimension_semantics=("parallel", "arbitrary"),
                vmem_limit_bytes=budget,
            ),
            cost_estimate=cost,
        )(x2d, p["w1_bf"], p["b1_2d"], p["g_2d"], p["be_2d"], p["w2_bf"], p["b2_2d"])

    if out_pad != output_size:
        out2d = out2d[:, :output_size]    # strip lane padding (layout plumbing only)
    return out2d.reshape(*lead_shape, output_size)


# ---------------------------------------------------------------------------
# Pure-JAX reference and demo
# ---------------------------------------------------------------------------

def simple_dense_ref(x, w1, b1, gamma, beta, w2, b2):
    h = x @ w1 + b1
    mean = jnp.mean(h, axis=-1, keepdims=True)
    var = jnp.mean((h - mean) ** 2, axis=-1, keepdims=True)
    h = (h - mean) * jax.lax.rsqrt(var + LN_EPS)
    h = h * gamma + beta
    h = jnp.maximum(h, 0.0)
    return h @ w2 + b2


if __name__ == "__main__":
    batch, seq = 2, 8
    input_size, hidden_size, output_size = 32, 64, 16

    key = jax.random.PRNGKey(0)
    kx, kw1, kb1, kw2, kb2 = jax.random.split(key, 5)

    x = jax.random.normal(kx, (batch, seq, input_size), dtype=jnp.float32)

    # PyTorch-style uniform init; weights stored pre-transposed as [in, out].
    bound1 = 1.0 / (input_size ** 0.5)
    w1 = jax.random.uniform(kw1, (input_size, hidden_size), jnp.float32, -bound1, bound1)
    b1 = jax.random.uniform(kb1, (hidden_size,), jnp.float32, -bound1, bound1)
    bound2 = 1.0 / (hidden_size ** 0.5)
    w2 = jax.random.uniform(kw2, (hidden_size, output_size), jnp.float32, -bound2, bound2)
    b2 = jax.random.uniform(kb2, (output_size,), jnp.float32, -bound2, bound2)
    gamma = jnp.ones((hidden_size,), jnp.float32)   # nn.LayerNorm defaults
    beta = jnp.zeros((hidden_size,), jnp.float32)

    params = prepare_simple_dense_params(w1, b1, gamma, beta, w2, b2)  # one-time prep
    out = simple_dense_pallas(x, params)
    out = jax.block_until_ready(out)

    ref = simple_dense_ref(x, w1, b1, gamma, beta, w2, b2)
    assert out.shape == (batch, seq, output_size)
    # bf16 MXU operands -> loosened tolerance vs the all-f32 reference.
    assert jnp.allclose(out, ref, atol=3e-2, rtol=3e-2), "mismatch vs reference"

    print("KERNEL_OK")
</pallas_src>

<mosaic_0001>
module attributes {stable_mosaic.version = 11 : i64} {
  func.func @_fused_kernel(%arg0: i32, %arg1: memref<8x32xf32, #tpu.memory_space<vmem>>, %arg2: memref<32x64xbf16, #tpu.memory_space<vmem>>, %arg3: memref<1x64xf32, #tpu.memory_space<vmem>>, %arg4: memref<1x64xf32, #tpu.memory_space<vmem>>, %arg5: memref<1x64xf32, #tpu.memory_space<vmem>>, %arg6: memref<64x128xbf16, #tpu.memory_space<vmem>>, %arg7: memref<1x128xf32, #tpu.memory_space<vmem>>, %arg8: memref<8x128xf32, #tpu.memory_space<vmem>>) attributes {dimension_semantics = [#tpu.dimension_semantics<parallel>], iteration_bounds = array<i64: 2>, scalar_prefetch = 0 : i64, scratch_operands = 0 : i64, tpu.core_type = #tpu.core_type<tc>, window_params = [{transform_indices = @transform_0, window_bounds = array<i64: 8, 32>}, {pipeline_mode = #tpu.pipeline_mode<synchronous>, transform_indices = @transform_1, window_bounds = array<i64: 32, 64>}, {pipeline_mode = #tpu.pipeline_mode<synchronous>, transform_indices = @transform_2, window_bounds = array<i64: 1, 64>}, {pipeline_mode = #tpu.pipeline_mode<synchronous>, transform_indices = @transform_3, window_bounds = array<i64: 1, 64>}, {pipeline_mode = #tpu.pipeline_mode<synchronous>, transform_indices = @transform_4, window_bounds = array<i64: 1, 64>}, {pipeline_mode = #tpu.pipeline_mode<synchronous>, transform_indices = @transform_5, window_bounds = array<i64: 64, 128>}, {pipeline_mode = #tpu.pipeline_mode<synchronous>, transform_indices = @transform_6, window_bounds = array<i64: 1, 128>}, {transform_indices = @transform_7, window_bounds = array<i64: 8, 128>}]} {
    %c0 = arith.constant 0 : index
    %c0_0 = arith.constant 0 : index
    %0 = vector.load %arg1[%c0, %c0_0] : memref<8x32xf32, #tpu.memory_space<vmem>>, vector<8x32xf32>
    %1 = arith.truncf %0 : vector<8x32xf32> to vector<8x32xbf16>
    %c0_1 = arith.constant 0 : index
    %c0_2 = arith.constant 0 : index
    %2 = vector.load %arg2[%c0_1, %c0_2] : memref<32x64xbf16, #tpu.memory_space<vmem>>, vector<32x64xbf16>
    %cst = arith.constant dense<0.000000e+00> : vector<8x64xf32>
    %3 = tpu.matmul %1, %2, %cst {dimension_numbers = #tpu.dot_dimension_numbers<[1], [0], [0], [1], [0, 0, 1, 1], [], []>} : vector<8x32xbf16>, vector<32x64xbf16>, vector<8x64xf32> -> vector<8x64xf32>
    %c0_3 = arith.constant 0 : index
    %c0_4 = arith.constant 0 : index
    %4 = vector.load %arg3[%c0_3, %c0_4] : memref<1x64xf32, #tpu.memory_space<vmem>>, vector<1x64xf32>
    %5 = vector.broadcast %4 : vector<1x64xf32> to vector<8x64xf32>
    %6 = arith.addf %3, %5 : vector<8x64xf32>
    %cst_5 = arith.constant dense<0.000000e+00> : vector<8xf32>
    %7 = vector.multi_reduction <add>, %6, %cst_5 [1] : vector<8x64xf32> to vector<8xf32>
    %8 = vector.shape_cast %7 : vector<8xf32> to vector<8x1xf32>
    %cst_6 = arith.constant 6.400000e+01 : f32
    %9 = vector.broadcast %cst_6 : f32 to vector<8x1xf32>
    %10 = arith.divf %8, %9 : vector<8x1xf32>
    %11 = arith.mulf %6, %6 : vector<8x64xf32>
    %cst_7 = arith.constant dense<0.000000e+00> : vector<8xf32>
    %12 = vector.multi_reduction <add>, %11, %cst_7 [1] : vector<8x64xf32> to vector<8xf32>
    %13 = vector.shape_cast %12 : vector<8xf32> to vector<8x1xf32>
    %cst_8 = arith.constant 6.400000e+01 : f32
    %14 = vector.broadcast %cst_8 : f32 to vector<8x1xf32>
    %15 = arith.divf %13, %14 : vector<8x1xf32>
    %16 = arith.mulf %10, %10 : vector<8x1xf32>
    %17 = arith.subf %15, %16 : vector<8x1xf32>
    %cst_9 = arith.constant 0.000000e+00 : f32
    %18 = vector.broadcast %cst_9 : f32 to vector<8x1xf32>
    %19 = arith.maximumf %17, %18 : vector<8x1xf32>
    %20 = vector.broadcast %10 : vector<8x1xf32> to vector<8x64xf32>
    %21 = arith.subf %6, %20 : vector<8x64xf32>
    %cst_10 = arith.constant 9.99999974E-6 : f32
    %22 = vector.broadcast %cst_10 : f32 to vector<8x1xf32>
    %23 = arith.addf %19, %22 : vector<8x1xf32>
    %24 = math.rsqrt %23 : vector<8x1xf32>
    %25 = vector.broadcast %24 : vector<8x1xf32> to vector<8x64xf32>
    %26 = arith.mulf %21, %25 : vector<8x64xf32>
    %c0_11 = arith.constant 0 : index
    %c0_12 = arith.constant 0 : index
    %27 = vector.load %arg4[%c0_11, %c0_12] : memref<1x64xf32, #tpu.memory_space<vmem>>, vector<1x64xf32>
    %28 = vector.broadcast %27 : vector<1x64xf32> to vector<8x64xf32>
    %29 = arith.mulf %26, %28 : vector<8x64xf32>
    %c0_13 = arith.constant 0 : index
    %c0_14 = arith.constant 0 : index
    %30 = vector.load %arg5[%c0_13, %c0_14] : memref<1x64xf32, #tpu.memory_space<vmem>>, vector<1x64xf32>
    %31 = vector.broadcast %30 : vector<1x64xf32> to vector<8x64xf32>
    %32 = arith.addf %29, %31 : vector<8x64xf32>
    %cst_15 = arith.constant 0.000000e+00 : f32
    %33 = vector.broadcast %cst_15 : f32 to vector<8x64xf32>
    %34 = arith.maximumf %32, %33 : vector<8x64xf32>
    %35 = arith.truncf %34 : vector<8x64xf32> to vector<8x64xbf16>
    %c0_16 = arith.constant 0 : index
    %c0_17 = arith.constant 0 : index
    %36 = vector.load %arg6[%c0_16, %c0_17] : memref<64x128xbf16, #tpu.memory_space<vmem>>, vector<64x128xbf16>
    %cst_18 = arith.constant dense<0.000000e+00> : vector<8x128xf32>
    %37 = tpu.matmul %35, %36, %cst_18 {dimension_numbers = #tpu.dot_dimension_numbers<[1], [0], [0], [1], [0, 0, 1, 1], [], []>} : vector<8x64xbf16>, vector<64x128xbf16>, vector<8x128xf32> -> vector<8x128xf32>
    %c0_19 = arith.constant 0 : index
    %c0_20 = arith.constant 0 : index
    %38 = vector.load %arg7[%c0_19, %c0_20] : memref<1x128xf32, #tpu.memory_space<vmem>>, vector<1x128xf32>
    %39 = vector.broadcast %38 : vector<1x128xf32> to vector<8x128xf32>
    %40 = arith.addf %37, %39 : vector<8x128xf32>
    %c0_21 = arith.constant 0 : index
    %c0_22 = arith.constant 0 : index
    %41 = vector.load %arg8[%c0_21, %c0_22] : memref<8x128xf32, #tpu.memory_space<vmem>>, vector<8x128xf32>
    tpu.vector_store %arg8[%c0_21, %c0_22], %40 {strides = array<i32>} : memref<8x128xf32, #tpu.memory_space<vmem>>, vector<8x128xf32>,
    return
  }
  func.func @transform_0(%arg0: i32) -> (i32, i32) {
    %c0_i32 = arith.constant 0 : i32
    %c0_i32_0 = arith.constant 0 : i32
    return %arg0, %c0_i32 : i32, i32
  }
  func.func @transform_1(%arg0: i32) -> (i32, i32) {
    %c0_i32 = arith.constant 0 : i32
    %c0_i32_0 = arith.constant 0 : i32
    %c0_i32_1 = arith.constant 0 : i32
    return %c0_i32, %c0_i32_0 : i32, i32
  }
  func.func @transform_2(%arg0: i32) -> (i32, i32) {
    %c0_i32 = arith.constant 0 : i32
    %c0_i32_0 = arith.constant 0 : i32
    %c0_i32_1 = arith.constant 0 : i32
    return %c0_i32, %c0_i32_0 : i32, i32
  }
  func.func @transform_3(%arg0: i32) -> (i32, i32) {
    %c0_i32 = arith.constant 0 : i32
    %c0_i32_0 = arith.constant 0 : i32
    %c0_i32_1 = arith.constant 0 : i32
    return %c0_i32, %c0_i32_0 : i32, i32
  }
  func.func @transform_4(%arg0: i32) -> (i32, i32) {
    %c0_i32 = arith.constant 0 : i32
    %c0_i32_0 = arith.constant 0 : i32
    %c0_i32_1 = arith.constant 0 : i32
    return %c0_i32, %c0_i32_0 : i32, i32
  }
  func.func @transform_5(%arg0: i32) -> (i32, i32) {
    %c0_i32 = arith.constant 0 : i32
    %c0_i32_0 = arith.constant 0 : i32
    %c0_i32_1 = arith.constant 0 : i32
    return %c0_i32, %c0_i32_0 : i32, i32
  }
  func.func @transform_6(%arg0: i32) -> (i32, i32) {
    %c0_i32 = arith.constant 0 : i32
    %c0_i32_0 = arith.constant 0 : i32
    %c0_i32_1 = arith.constant 0 : i32
    return %c0_i32, %c0_i32_0 : i32, i32
  }
  func.func @transform_7(%arg0: i32) -> (i32, i32) {
    %c0_i32 = arith.constant 0 : i32
    %c0_i32_0 = arith.constant 0 : i32
    return %arg0, %c0_i32 : i32, i32
  }
}

</mosaic_0001>

<bundles_post_ra>
// kernel: tpu_custom_call.1
= control target key start
LH: loop header
LB: loop body
LE: loop exit
PB: predicated region body
PF: predicated region fallthrough
CT: control target
= control target key end

     0   :  { %12 = vsyncpa [#allocation3], 0  ;;  %s1204_s0 = inlined_call_operand.hbm [shape: f32[16,32], index: 0, kind: input, shape index: {}]   ;;  %s1205_s1 = inlined_call_operand.hbm [shape: bf16[32,64], index: 1, kind: input, shape index: {}]   ;;  %s1206_s2 = inlined_call_operand.vmem [shape: f32[1,64], index: 2, kind: input, shape index: {}]   ;;  %s1207_s3 = inlined_call_operand.vmem [shape: f32[1,64], index: 3, kind: input, shape index: {}]   ;;  %s1208_s4 = inlined_call_operand.vmem [shape: f32[1,64], index: 4, kind: input, shape index: {}]   ;;  %s1209_s5 = inlined_call_operand.hbm [shape: bf16[64,128], index: 5, kind: input, shape index: {}]   ;;  %s1210_s6 = inlined_call_operand.vmem [shape: f32[1,128], index: 6, kind: input, shape index: {}]   ;;  %s1211_s7 = inlined_call_operand.hbm [shape: f32[16,128], index: 7, kind: output, shape index: {}]  }
   0x1   :  { %14 = vsyncpa [#allocation3 + $0x1], 0 }
   0x2   :  { %15 = vsyncpa [#allocation6], 0 }
   0x3   :  { %16 = vsyncpa [#allocation4], 0 }
   0x4   :  { %18 = vsyncpa [#allocation4 + $0x1], 0  ;;  %s956_s24 = smov 0   ;;  %s958_s25 = smov 0  }
   0x5   :  { %s960_s26 = smov 0   ;;  %s962_s27 = smov 0  }
   0x6 LB: > { %s977_s28 = sadd.s32 4294967295, %s906_s27   ;;  %s615_s29 = sadd.s32 4294967294, %s906_s27   ;;  %s906_s27 = sphi %s962_s27, %s1231_s27   ;;  %s902_s26 = sphi %s960_s26, %s1230_s26   ;;  %s898_s25 = sphi %s958_s25, %s1229_s25   ;;  %s894_s24 = sphi %s956_s24, %s1228_s24  }
   0x7   : > { %p44_p0 = scmp.ne.s32.totalorder %s898_s25, %s894_s24  ;;  %p1212_p1 = scmp.eq.s32.totalorder %s977_s28, 0 }
   0x8   : > { %p200_p3 = scmp.eq.s32.totalorder %s615_s29, 1  ;;  %p616_p5 = scmp.ge.s32.totalorder %s906_s27, 1 }
   0x9   : > { %p986_p4 = por %p1212_p1, %p44_p0  ;;  %p207_p7 = scmp.lt.s32.totalorder %s906_s27, 3 }
   0xa   : > { %p991_p6 = por %p200_p3, %p44_p0  ;;  %s908_s10 = smov [#allocation5]  }
   0xb   : > { %s1215_s30 = scalar_select %p986_p4, 1, 0 }
   0xc   : > { %s1216_s8 = scalar_select %p991_p6, 1, 0 }
   0xd   : > { %p996_p8 = pnand %p616_p5, %p207_p7  ;;  %s219_s11 = sshll.u32 %s908_s10, 4  ;;  %s1000_s11 = int_to_ptr.vmem [resolvable:$true] %s219_s11 }
   0xe   : > { %s909_s13 = smov [#allocation7]   ;;  %s750_s17 = scalar_lea.hbm %s1205_s1, 256 }
   0xf   : > { %p683_p9 = pneg %p996_p8  ;;  %s241_s14 = sshll.u32 %s909_s13, 4  ;;  %s1011_s14 = int_to_ptr.vmem [resolvable:$true] %s241_s14 }
  0x10   : > { %p751_p12 = scmp.ne.s32.totalorder %s1205_s1, %s750_s17  ;;  %p757_p5 = scmp.lt.u32.totalorder %s750_s17, %s1205_s1 }
  0x11   : > { %p1007_p11 = pnand %p683_p9, %p1212_p1 }
  0x13   : > { %p752_p13 = pneg %p1007_p11 }
  0x15   : > { %p753_p0 = pnand %p752_p13, %p751_p12 }
  0x17   : > { %p754_p3 = pneg %p753_p0 }
  0x19   : > { %p759_p7 = pnand %p757_p5, %p754_p3 }
  0x1b   : > { %762 = shalt.err (!%p759_p7)
}
  0x1c   : > { %s763_s22 = scalar_lea.vmem %s1000_s11, 256  ;;  %p771_p2 = scmp.lt.s32.totalorder %s1000_s11, %s1000_s11 }
  0x1d   : > { %p764_p9 = scmp.ne.s32.totalorder %s1000_s11, %s763_s22  ;;  %p772_p12 = scmp.lt.s32.totalorder %s763_s22, %s763_s22 }
  0x1f   : > { %p766_p10 = pnand %p764_p9, %p752_p13  ;;  %p773_p0 = por %p772_p12, %p771_p2 }
  0x21   : > { %p767_p1 = pneg %p766_p10 }
  0x23   : > { %p774_p6 = pnand %p773_p0, %p767_p1 }
  0x25   : > { %777 = shalt.err (!%p774_p6)
}
  0x26   : > { %s910_s23 = smov 64   ;;  %s911_s29 = smov 4  }
  0x27   : > { %686 = dma.hbm_to_vmem [thread:$0]  (!%p1007_p11), %s1205_s1, 256, %s1000_s11, [#allocation6], %s910_s23, %s910_s23, %s911_s29  }
  0x28   : > { %s778_s17 = scalar_lea.hbm %s1209_s5, 512 }
  0x29   : > { %p779_p2 = scmp.ne.s32.totalorder %s1209_s5, %s778_s17  ;;  %p785_p10 = scmp.lt.u32.totalorder %s778_s17, %s1209_s5 }
  0x2b   : > { %p781_p1 = pnand %p779_p2, %p752_p13 }
  0x2d   : > { %p782_p6 = pneg %p781_p1 }
  0x2f   : > { %p787_p3 = pnand %p785_p10, %p782_p6 }
  0x31   : > { %790 = shalt.err (!%p787_p3)
}
  0x32   : > { %s791_s11 = scalar_lea.vmem %s1011_s14, 512  ;;  %p799_p12 = scmp.lt.s32.totalorder %s1011_s14, %s1011_s14 }
  0x33   : > { %p792_p5 = scmp.ne.s32.totalorder %s1011_s14, %s791_s11  ;;  %p800_p0 = scmp.lt.s32.totalorder %s791_s11, %s791_s11 }
  0x35   : > { %p794_p7 = pnand %p792_p5, %p752_p13  ;;  %p801_p2 = por %p800_p0, %p799_p12 }
  0x37   : > { %p795_p9 = pneg %p794_p7 }
  0x39   : > { %p802_p1 = pnand %p801_p2, %p795_p9 }
  0x3b   : > { %805 = shalt.err (!%p802_p1)
}
  0x3c   : > { %689 = dma.hbm_to_vmem [thread:$0]  (!%p1007_p11), %s1209_s5, 512, %s1011_s14, [#allocation6], %s910_s23, %s910_s23, %s911_s29  }
  0x3d   : > { %s1066_s13 = sadd.s32 1, %s906_s27   ;;  %s31_s12 = sadd.s32 1, %s902_s26 }
  0x3e   : > { %s28_s15 = ssub.s32 %s906_s27, %s1066_s13  ;;  %p38_p13 = scmp.ne.s32.totalorder %s902_s26, %s898_s25 }
  0x3f   : > { %p29_p6 = scmp.eq.s32.totalorder %s28_s15, 0  ;;  %p39_p10 = scmp.eq.s32.totalorder %s906_s27, 0 }
  0x40   : > { %p1219_p3 = scmp.eq.s32.totalorder %s977_s28, 1  ;;  %p700_p7 = scmp.lt.s32.totalorder %s906_s27, 2 }
  0x41   : > { %s1082_s17 = scalar_select %p29_p6, %s902_s26, %s31_s12  }
  0x42   : > { %p1076_p5 = por %p1219_p3, %p38_p13  ;;  %p40_p9 = por %p39_p10, %p38_p13 }
  0x43   : > { %s258_s18 = sand.u32 1, %s902_s26   ;;  %s621_s14 = sshll.u32 %s906_s27, 7 }
  0x44   : > { %s1220_s16 = scalar_select %p1076_p5, 1, 0 }
  0x45   : > { %s620_s19 = sshll.u32 %s258_s18, 3  ;;  %s1089_s20 = scalar_lea.hbm %s1204_s0, %s621_s14 }
  0x46   : > { %s262_s21 = scalar_lea.vmem [#allocation2], %s620_s19  ;;  %p1093_p11 = pnand %p700_p7, %p40_p9 }
  0x47   : > { %s269_s11 = sshll.u32 %s262_s21, 4  ;;  %s259_s10 = scalar_lea.sflag [#allocation3], %s258_s18  ;;  %s1091_s11 = int_to_ptr.vmem [resolvable:$true] %s269_s11 }
  0x48   : > { %s806_s12 = scalar_lea.hbm %s1089_s20, 128  ;;  %p808_p0 = pneg %p1093_p11 }
  0x49   : > { %p807_p12 = scmp.ne.s32.totalorder %s1089_s20, %s806_s12  ;;  %s811_s14 = scalar_lea.hbm %s1204_s0, 256 }
  0x4a   : > { %p812_p13 = scmp.lt.u32.totalorder %s1089_s20, %s1204_s0  ;;  %p813_p6 = scmp.lt.u32.totalorder %s811_s14, %s806_s12 }
  0x4b   : > { %p809_p2 = pnand %p808_p0, %p807_p12  ;;  %p815_p3 = scmp.lt.u32.totalorder %s806_s12, %s1089_s20 }
  0x4c   : > { %p814_p10 = por %p813_p6, %p812_p13 }
  0x4d   : > { %p810_p1 = pneg %p809_p2 }
  0x4e   : > { %p816_p7 = por %p815_p3, %p814_p10 }
  0x50   : > { %p817_p9 = pnand %p816_p7, %p810_p1 }
  0x52   : > { %820 = shalt.err (!%p817_p9)
}
  0x53   : > { %s821_s18 = scalar_lea.vmem %s1091_s11, 128  ;;  %s912_s21 = smov [#allocation2]  }
  0x54   : > { %p822_p12 = scmp.ne.s32.totalorder %s1091_s11, %s821_s18  ;;  %s826_s15 = sshll.u32 %s912_s21, 4  ;;  %s827_s15 = int_to_ptr.vmem [resolvable:$false] %s826_s15 }
  0x55   : > { %s828_s19 = scalar_lea.vmem %s827_s15, 256  ;;  %p829_p4 = scmp.lt.s32.totalorder %s1091_s11, %s827_s15 }
  0x56   : > { %p824_p2 = pnand %p822_p12, %p808_p0  ;;  %p830_p13 = scmp.lt.s32.totalorder %s828_s19, %s821_s18 }
  0x58   : > { %p825_p5 = pneg %p824_p2  ;;  %p831_p6 = por %p830_p13, %p829_p4 }
  0x5a   : > { %p832_p10 = pnand %p831_p6, %p825_p5 }
  0x5c   : > { %835 = shalt.err (!%p832_p10)
}
  0x5d   : > { %693 = dma.hbm_to_vmem [thread:$0]  (!%p1093_p11), %s1089_s20, 128, %s1091_s11, %s259_s10  }
  0x5e   : > { %278 = sbr.rel (%p996_p8) target bundleno = 733 (0x2dd), region = 48  ;;  %s1125_s12 = sand.u32 (!%p996_p8), 1, %s898_s25  }
  0x5f   : > { %s623_s14 = sshll.u32 (!%p996_p8), %s1125_s12, 3  ;;  %s281_s23 = scalar_lea.sflag (!%p996_p8), [#allocation3], %s1125_s12 }
  0x60   : > { %s284_s29 = scalar_lea.vmem (!%p996_p8), [#allocation2], %s623_s14  ;;  %p1222_p4 = scmp.ne.s32.totalorder (!%p996_p8), %s1215_s30, 0 }
  0x65   : > { %881 = dma.done.wait (%p1222_p4), %s281_s23, 128  }
  0x66   : > { %883 = vsyncadd (%p1222_p4), %s281_s23, 4294967168  ;;  %p1223_p5 = scmp.eq.s32.totalorder %s977_s28, 0 }
  0x68   : > { %885 = dma.done.wait (%p1223_p5), [#allocation6], 768   ;;  %p1224_p8 = pmov %p1223_p5 }
  0x69   : > { %v913_v0 = vmov 0.0   ;;  %vm914_vm0 = vmmov 0   ;;  %v742_v1 = vld [vmem:[#allocation5] sm:$0xff]   ;;  %v743_v2 = vld [vmem:[#allocation5 + $0x8] sm:$0xff]   ;;  %v324_v3 = vld [vmem:[%s284_s29] sm:$0xff]  ;;  %vm349_vm1 = vcmask 261120  }
  0x6a   : > { %887 = vsyncadd (%p1224_p8), [#allocation6], 4294966528  ;;  %651 = vmatprep.subr.bf16.mxu0 %v913_v0  ;;  %655 = vmatprep.mubr.msk.bf16.mxu0 %vm914_vm0, %v913_v0  ;;  %v325_v4 = vpack.c.bf16 %v324_v3, %v324_v3  ;;  %v627_v5 = vld [vmem:[%s1206_s2] ss:$0 sm:$0xff]  ;;  %vm393_vm2 = vcmask 523264   ;;  %v745_v15 = vld [vmem:[#allocation7 + $0x8] sm:$0xff]  }
  0x6b   : > { %659 = vmatprep.subr.bf16.mxu1 %v913_v0  ;;  %667 = vmatprep.mubr.msk.bf16.mxu1 %vm914_vm0, %v913_v0  ;;  %v744_v14 = vld [vmem:[#allocation7] sm:$0xff]   ;;  %v746_v16 = vld [vmem:[#allocation7 + $0x10] sm:$0xff]   ;;  %v747_v17 = vld [vmem:[#allocation7 + $0x18] sm:$0xff]   ;;  %s640_s15 = sshll.u32 %s977_s28, 7  ;;  %s322_s19 = scalar_lea.vmem [#allocation8], %s623_s14 }
  0x6c   : > { %652 = vmatpush3.bf16.msra.mxu0 %v742_v1  ;;  %660 = vmatpush3.bf16.msra.mxu1 %v744_v14  ;;  %v631_v28 = vld [vmem:[%s1207_s3] ss:$0 sm:$0xff]  ;;  %s526_s23 = sshll.u32 %s322_s19, 4  ;;  %s1160_s9 = scalar_lea.hbm %s1211_s7, %s640_s15  ;;  %s1162_s23 = int_to_ptr.vmem [resolvable:$true] %s526_s23 }
  0x6d   : > { %653 = vmatprep.subr.bf16.mxu0 %v913_v0  ;;  %661 = vmatprep.subr.bf16.mxu1 %v913_v0  ;;  %v632_v30 = vld [vmem:[%s1208_s4] ss:$0 sm:$0xff]  ;;  %s513_s28 = scalar_lea.sflag [#allocation4], %s1125_s12  ;;  %s836_s20 = scalar_lea.vmem %s1162_s23, 128 }
  0x6e   : > { %v633_v35 = vld [vmem:[%s1210_s6] ss:$0 sm:$0xff]  ;;  %p837_p11 = scmp.ne.s32.totalorder %s1162_s23, %s836_s20  ;;  %p1225_p0 = scmp.ne.s32.totalorder %s1220_s16, 0 }
  0x6f   : > { %s915_s14 = smov [#allocation8]  }
  0x70   : > { %654 = vmatpush3.bf16.msra.mxu0 %v743_v2  ;;  %662 = vmatpush3.bf16.msra.mxu1 %v745_v15  ;;  %p838_p1 = pnand %p837_p11, %p1225_p0  ;;  %s840_s11 = sshll.u32 %s915_s14, 4  ;;  %s841_s11 = int_to_ptr.vmem [resolvable:$false] %s840_s11 }
  0x71   : > { %663 = vmatprep.subr.bf16.mxu1 %v913_v0  ;;  %s842_s22 = scalar_lea.vmem %s841_s11, 256  ;;  %p843_p7 = scmp.lt.s32.totalorder %s1162_s23, %s841_s11 }
  0x72   : > { %p839_p3 = pneg %p838_p1  ;;  %p844_p9 = scmp.lt.s32.totalorder %s842_s22, %s836_s20 }
  0x73   : > { %656 = vmatmul.mubr.msk.bf16.vlgmr.msra.gmra.mrb[0].mxu0 %vm349_vm1, %v325_v4 }
  0x74   : > { %664 = vmatpush3.bf16.msra.mxu1 %v746_v16  ;;  %p845_p12 = por %p844_p9, %p843_p7 }
  0x75   : > { %665 = vmatprep.subr.bf16.mxu1 %v913_v0 }
  0x76   : > { %p846_p2 = pnand %p845_p12, %p839_p3 }
  0x78   : > { %666 = vmatpush3.bf16.msra.mxu1 %v747_v17 }
 0x146   : > { %v387_v6 = vpop.f32.mrb[0].mxu0 }
 0x147   : > { %v388_v7 = vadd.f32 %v627_v5, %v387_v6  ;;  %v657_v8 = vpop.f32.mrb[1].mxu0 }
 0x148   : > { %v390_v9 = vpop.f32.mrb[2].mxu0 }
 0x149   : > { %v658_v10 = vpop.f32.mrb[3].mxu0  ;;  %v394_v11 = vsel %vm393_vm2, %v388_v7, 0.0  ;;  %v399_v12 = vmul.f32 %v388_v7, %v388_v7 }
 0x14a   : > { %395 = vadd.xlane.f32.xlu0 %v394_v11 }
 0x14b   : > { %v400_v13 = vsel %vm393_vm2, %v399_v12, 0.0 }
 0x14e   : > { %401 = vadd.xlane.f32.xlu0 %v400_v13 }
 0x1d7   : > { %v396_v18 = vpop.xlane.xlu0 %395 }
 0x1d8   : > { %v398_v19 = vmul.f32 0.015625, %v396_v18 }
 0x1da   : > { %v404_v21 = vmul.f32 %v398_v19, %v398_v19  ;;  %v407_v26 = vsub.f32 %v388_v7, %v398_v19 }
 0x1db   : > { %v402_v20 = vpop.xlane.xlu0 %401 }
 0x1dc   : > { %v403_v22 = vmul.f32 0.015625, %v402_v20 }
 0x1de   : > { %v405_v23 = vsub.f32 %v403_v22, %v404_v21 }
 0x1e0   : > { %v406_v24 = vmax.f32 %v405_v23, 0.0 }
 0x1e2   : > { %v408_v25 = vadd.f32 1e-05, %v406_v24 }
 0x1e4   : > { %748 = vrsqrt.f32 %v408_v25 }
 0x1ee   : > { %v749_v27 = vpop.eup %748 }
 0x1ef   : > { %v410_v29 = vmul.f32 %v749_v27, %v407_v26 }
 0x1f1   : > { %v418_v31 = vmul.f32 %v631_v28, %v410_v29 }
 0x1f3   : > { %v426_v32 = vadd.f32 %v632_v30, %v418_v31 }
 0x1f5   : > { %v427_v33 = vmax.f32 %v426_v32, 0.0 }
 0x1f7   : > { %v428_v34 = vpack.c.bf16 %v427_v33, %v427_v33 }
 0x1f9   : > { %668 = vmatmul.mubr.msk.bf16.vlgmr.msra.gmra.mrb[0].mxu1 %vm393_vm2, %v428_v34 }
 0x2cc   : > { %v505_v36 = vpop.f32.mrb[0].mxu1 }
 0x2cd   : > { %v506_v37 = vadd.f32 %v633_v35, %v505_v36  ;;  %v669_v38 = vpop.f32.mrb[1].mxu1 }
 0x2ce   : > { %v508_v39 = vpop.f32.mrb[2].mxu1 }
 0x2cf   : > { %511 = vst [vmem:[%s322_s19] sm:$0xff] %v506_v37  ;;  %v670_v40 = vpop.f32.mrb[3].mxu1 }
 0x2d0   : > { %849 = shalt.err (!%p846_p2)
}
 0x2d1   : > { %s850_s12 = scalar_lea.hbm %s1160_s9, 128  ;;  %s854_s21 = scalar_lea.hbm %s1211_s7, 256 }
 0x2d2   : > { %p851_p13 = scmp.ne.s32.totalorder %s1160_s9, %s850_s12  ;;  %p855_p4 = scmp.lt.u32.totalorder %s1160_s9, %s1211_s7 }
 0x2d3   : > { %p856_p5 = scmp.lt.u32.totalorder %s854_s21, %s850_s12  ;;  %p858_p11 = scmp.lt.u32.totalorder %s850_s12, %s1160_s9 }
 0x2d4   : > { %p852_p6 = pnand %p851_p13, %p1225_p0 }
 0x2d5   : > { %p857_p8 = por %p856_p5, %p855_p4 }
 0x2d6   : > { %p853_p10 = pneg %p852_p6 }
 0x2d7   : > { %p859_p1 = por %p858_p11, %p857_p8 }
 0x2d9   : > { %p860_p3 = pnand %p859_p1, %p853_p10 }
 0x2db   : > { %863 = shalt.err (!%p860_p3)
}
 0x2dc   : > { %681 = dma.vmem_to_hbm [thread:$0]  (%p1225_p0), %s1162_s23, 128, %s1160_s9, %s513_s28  }
 0x2dd PF: > { %s538_s29 = sand.u32 1, %s894_s24   ;;  %p1226_p7 = scmp.ne.s32.totalorder %s1216_s8, 0 }
 0x2de   : > { %p1227_p9 = scmp.ge.s32.totalorder %s906_s27, 2  ;;  %s539_s30 = scalar_lea.sflag [#allocation4], %s538_s29 }
 0x2e0   : > { %p695_p12 = pnand %p1227_p9, %p1226_p7 }
 0x2e2   : > { %889 = dma.done.wait (!%p695_p12), %s539_s30, 128  }
 0x2e3   : > { %891 = vsyncadd (!%p695_p12), %s539_s30, 4294967168  ;;  %p21_p2 = scmp.ge.s32.totalorder %s1066_s13, 4   ;;  %s1228_s24 = smov %s898_s25 }
 0x2e4   : > { %s1229_s25 = smov %s902_s26  ;;  %s1230_s26 = smov %s1082_s17 }
 0x2e5   : > { %s1231_s27 = smov %s1066_s13  ;;  %23 = sbr.rel (!%p21_p2) target bundleno = 6 (0x6), region = 101 }
 0x2ec   :  { %544 = vsyncpa [#allocation3], 1 }
 0x2ed   :  { %546 = vsyncpa [#allocation3 + $0x1], 1 }
 0x2ee   :  { %547 = vsyncpa [#allocation6], 1 }
 0x2ef   :  { %548 = vsyncpa [#allocation4], 1 }
 0x2f0   :  { %550 = vsyncpa [#allocation4 + $0x1], 1 }

</bundles_post_ra>
